<compile_context>
chip_gen: v5e
topology: v5e:2x2
jax: 0.10.0
libtpu: 0.0.40
codegen_flags: <defaults>
</compile_context>

<pallas_src>
import functools

import jax
import jax.numpy as jnp
from jax.experimental import pallas as pl
from jax.experimental.pallas import tpu as pltpu

_MIB = 1024 * 1024


def _round_up(a, b):
    return (a + b - 1) // b * b


def _vmem_capacity_bytes():
    try:
        return int(pltpu.get_tpu_info().vmem_capacity_bytes)
    except Exception:
        return 64 * _MIB  # conservative fallback (v7x-sized)


def _resident_spec(block_shape):
    """Constant-index (VMEM-resident) operand: single-buffered when supported."""
    idx_map = lambda i: (0,) * len(block_shape)
    try:
        return pl.BlockSpec(block_shape, idx_map, pipeline_mode=pl.Buffered(1))
    except Exception:  # older API without pipeline_mode: fall back to default
        return pl.BlockSpec(block_shape, idx_map)


def _auto_tm(E, S_pad, x_bytes, logits_bytes, w_bytes, vmem_limit, granule):
    """Pick the largest batch tile whose working set fits the VMEM budget."""
    per_row = 2 * E * x_bytes            # streamed x (double-buffered)
    per_row += 2 * 128 * 4               # streamed labels (lane-padded, dbl-buf)
    per_row += 2 * S_pad * logits_bytes  # logits writeback (double-buffered)
    per_row += 6 * S_pad * 4             # f32 (TM,S_pad) epilogue temporaries
    resident = S_pad * E * w_bytes + S_pad * 4 + (1 << 20)  # W + b + slack
    budget = vmem_limit - resident
    if budget < per_row * granule:
        # TODO(synk): class-tiled online-logsumexp variant for huge num_of_spks.
        return granule
    tm = budget // per_row
    return int(min(512, max(granule, (tm // granule) * granule)))


def _siloss_kernel(x_ref, w_ref, b_ref, y_ref, partial_ref, *logits_refs,
                   batch, tm, write_logits):
    w = w_ref[...]                                    # (S_pad, E), VMEM-resident
    x = x_ref[...]                                    # (TM, E), streamed
    if x.dtype != w.dtype:                            # bf16 MXU path: cast in VMEM,
        x = x.astype(w.dtype)                         # no extra HBM copy of x
    b = b_ref[...]                                    # (1, S_pad) f32 (pad = -1e9)
    y = y_ref[...]                                    # (TM, 1) i32

    # Linear layer: contract E directly against W's native (S, E) layout
    # (no transpose), f32 accumulation on the MXU.
    logits = jax.lax.dot_general(
        x, w, dimension_numbers=(((1,), (1,)), ((), ())),
        preferred_element_type=jnp.float32) + b       # (TM, S_pad) f32

    if write_logits:
        logits_refs[0][...] = logits.astype(logits_refs[0].dtype)

    # Numerically-stable cross entropy. Padded classes carry bias = -1e9 so they
    # vanish in exp() and never win the max.
    m = jnp.max(logits, axis=-1, keepdims=True)                        # (TM, 1)
    lse = m + jnp.log(jnp.sum(jnp.exp(logits - m), axis=-1, keepdims=True))

    # Label logit via broadcasted compare + max (no (TM,S_pad) iota temporary).
    class_ids = jax.lax.broadcasted_iota(jnp.int32, (1, logits.shape[-1]), 1)
    label_logit = jnp.max(jnp.where(class_ids == y, logits, -jnp.inf),
                          axis=-1, keepdims=True)                      # (TM, 1)
    nll = lse - label_logit                                            # (TM, 1)

    # Mask padded batch rows of the last tile.
    row_ids = pl.program_id(0) * tm + jax.lax.broadcasted_iota(
        jnp.int32, (tm, 1), 0)
    nll = jnp.where(row_ids < batch, nll, 0.0)

    # Per-tile partial sum -> this tile's own lane-dense (8, 128) block.
    partial_ref[...] = jnp.broadcast_to(jnp.sum(nll), partial_ref.shape).astype(
        jnp.float32)


def prepare_si_loss_params(weight, bias, *, use_bf16=False):
    """Pad + cast the nn.Linear parameters once (outside the training step).

    weight: (S, E) = nn.Linear.weight, bias: (S,). Returns (w_p, b_p, S) where
    w_p is (S_pad, E) and b_p is (1, S_pad) with padded classes masked to -1e9.
    """
    S, E = weight.shape
    S_pad = _round_up(max(S, 128), 128)               # lane-dense class dim
    w_dtype = jnp.bfloat16 if use_bf16 else jnp.float32
    w_p = jnp.zeros((S_pad, E), w_dtype).at[:S, :].set(weight.astype(w_dtype))
    b_p = jnp.full((1, S_pad), -1e9, jnp.float32).at[0, :S].set(
        bias.astype(jnp.float32))
    return w_p, b_p, S


def si_loss_prepared(x, y, M, w_p, b_p, num_classes, *, tm=None,
                     return_logits=True, logits_dtype=None):
    """Cross-entropy over x @ W.T + b with labels y.repeat_interleave(M).

    x: (B, E), y: (N,) with N*M == B, (w_p, b_p, num_classes) from
    prepare_si_loss_params. Returns (loss, logits[B, S]) or just loss when
    return_logits=False.
    """
    B, E = x.shape
    S_pad, Ew = w_p.shape
    assert Ew == E and S_pad % 128 == 0
    assert y.shape[0] * M == B
    S = num_classes

    if logits_dtype is None:
        logits_dtype = x.dtype

    x_bytes = jnp.dtype(x.dtype).itemsize
    w_bytes = jnp.dtype(w_p.dtype).itemsize
    l_bytes = jnp.dtype(logits_dtype).itemsize if return_logits else 0

    # bf16 blocks need a 16-sublane granule; f32-only path can use 8.
    widths = [x_bytes, w_bytes] + ([l_bytes] if return_logits else [])
    granule = 16 if min(widths) < 4 else 8

    # Generation-aware VMEM budget (v7x: 64 MiB physical; v5e/v6e: 128 MiB).
    vmem_cap = _vmem_capacity_bytes()
    vmem_limit = 48 * _MIB if vmem_cap <= 64 * _MIB else 100 * _MIB
    vmem_limit = min(vmem_limit, vmem_cap)

    if tm is None:
        tm = _auto_tm(E, S_pad, x_bytes, l_bytes, w_bytes, vmem_limit, granule)

    TM = _round_up(min(tm, _round_up(B, granule)), granule)
    if B > granule:
        # Prefer >= 2 grid steps so the "parallel" axis can shard across both
        # v7x TensorCores (near-neutral on single-TC v5e/v6e).
        TM = min(TM, max(granule, _round_up(-(-B // 2), granule)))
    B_pad = _round_up(B, TM)
    num_tiles = B_pad // TM

    # Glue: repeat_interleave(M) on labels (tiny). Pad x / y only when needed.
    y_rep = jnp.repeat(y.astype(jnp.int32), M)[:, None]           # (B, 1)
    if B_pad != B:
        x_in = jnp.zeros((B_pad, E), x.dtype).at[:B].set(x)
        y_in = jnp.zeros((B_pad, 1), jnp.int32).at[:B].set(y_rep)
    else:
        x_in = x
        y_in = y_rep

    kernel = functools.partial(_siloss_kernel, batch=B, tm=TM,
                               write_logits=return_logits)

    out_shapes = [jax.ShapeDtypeStruct((num_tiles * 8, 128), jnp.float32)]
    out_specs = [pl.BlockSpec((8, 128), lambda i: (i, 0))]
    if return_logits:
        out_shapes.append(jax.ShapeDtypeStruct((B_pad, S_pad), logits_dtype))
        out_specs.append(pl.BlockSpec((TM, S_pad), lambda i: (i, 0)))

    outs = pl.pallas_call(
        kernel,
        out_shape=tuple(out_shapes),
        grid_spec=pltpu.PrefetchScalarGridSpec(
            num_scalar_prefetch=0,
            grid=(num_tiles,),
            in_specs=[
                pl.BlockSpec((TM, E), lambda i: (i, 0)),   # x: streamed
                _resident_spec((S_pad, E)),                # W: resident, 1-buffered
                _resident_spec((1, S_pad)),                # b: resident, 1-buffered
                pl.BlockSpec((TM, 1), lambda i: (i, 0)),   # labels: streamed
            ],
            out_specs=tuple(out_specs),
        ),
        compiler_params=pltpu.CompilerParams(
            dimension_semantics=("parallel",),             # megacore-shardable
            vmem_limit_bytes=vmem_limit),
    )(x_in, w_p, b_p, y_in)

    partials = outs[0]
    loss = jnp.sum(partials[::8, 0]) * (1.0 / B)      # mean without runtime divide
    if return_logits:
        logits = outs[1][:B, :S]
        return loss, logits
    return loss


def si_loss(x, weight, bias, y, M, *, tm=None, use_bf16=False,
            return_logits=True, logits_dtype=None):
    """Convenience one-shot wrapper (prepares params every call). For training
    loops, call prepare_si_loss_params once and use si_loss_prepared."""
    w_p, b_p, S = prepare_si_loss_params(weight, bias, use_bf16=use_bf16)
    return si_loss_prepared(x, y, M, w_p, b_p, S, tm=tm,
                            return_logits=return_logits,
                            logits_dtype=logits_dtype)


def _reference(x, weight, bias, y, M):
    y_rep = jnp.repeat(y, M)
    logits = x @ weight.T + bias
    logp = jax.nn.log_softmax(logits, axis=-1)
    nll = -jnp.take_along_axis(logp, y_rep[:, None], axis=-1)[:, 0]
    return jnp.mean(nll), logits


if __name__ == "__main__":
    key = jax.random.PRNGKey(0)
    k1, k2, k3, k4 = jax.random.split(key, 4)

    # ---- Config 1: small shapes consistent with the module (hp.train.M = 2) ----
    N, M = 4, 2
    emb_size, num_of_spks = 32, 16
    B = N * M
    x = jax.random.normal(k1, (B, emb_size), dtype=jnp.float32)
    weight = jax.random.normal(k2, (num_of_spks, emb_size), dtype=jnp.float32) * 0.1
    bias = jax.random.normal(k3, (num_of_spks,), dtype=jnp.float32) * 0.01
    y = jax.random.randint(k4, (N,), 0, num_of_spks, dtype=jnp.int32)

    loss, logits = si_loss(x, weight, bias, y, M)
    loss, logits = jax.block_until_ready((loss, logits))
    ref_loss, ref_logits = _reference(x, weight, bias, y, M)
    assert jnp.allclose(logits, ref_logits, atol=1e-5, rtol=1e-5)
    assert jnp.allclose(loss, ref_loss, atol=1e-5, rtol=1e-5)

    # ---- Config 2: prepared-params path, batch tiling (grid=3), batch+class pad ----
    N2, M2 = 24, 3
    emb2, spk2 = 32, 100
    B2 = N2 * M2
    x2 = jax.random.normal(k1, (B2, emb2), dtype=jnp.float32)
    w2 = jax.random.normal(k2, (spk2, emb2), dtype=jnp.float32) * 0.1
    b2 = jax.random.normal(k3, (spk2,), dtype=jnp.float32) * 0.01
    y2 = jax.random.randint(k4, (N2,), 0, spk2, dtype=jnp.int32)

    w_p2, b_p2, S2 = prepare_si_loss_params(w2, b2)
    loss2, logits2 = si_loss_prepared(x2, y2, M2, w_p2, b_p2, S2, tm=32)
    loss2, logits2 = jax.block_until_ready((loss2, logits2))
    ref_loss2, ref_logits2 = _reference(x2, w2, b2, y2, M2)
    assert jnp.allclose(logits2, ref_logits2, atol=1e-5, rtol=1e-5)
    assert jnp.allclose(loss2, ref_loss2, atol=1e-5, rtol=1e-5)

    # ---- Config 3: bf16 W (f32 accumulate) + bf16 logits writeback ----
    loss3, logits3 = si_loss(x2, w2, b2, y2, M2, tm=32, use_bf16=True)
    loss3, logits3 = jax.block_until_ready((loss3, logits3))
    assert jnp.allclose(logits3, ref_logits2, atol=5e-2, rtol=5e-2)
    assert jnp.allclose(loss3, ref_loss2, atol=5e-2, rtol=5e-2)

    loss3b, logits3b = si_loss(x2, w2, b2, y2, M2, tm=32, use_bf16=True,
                               logits_dtype=jnp.bfloat16)
    loss3b, logits3b = jax.block_until_ready((loss3b, logits3b))
    assert jnp.allclose(logits3b.astype(jnp.float32), ref_logits2,
                        atol=5e-2, rtol=5e-2)
    assert jnp.allclose(loss3b, ref_loss2, atol=5e-2, rtol=5e-2)

    # ---- Config 4: loss-only fast path (no logits HBM writeback) ----
    loss4 = si_loss_prepared(x2, y2, M2, w_p2, b_p2, S2, tm=32,
                             return_logits=False)
    loss4 = jax.block_until_ready(loss4)
    assert jnp.allclose(loss4, ref_loss2, atol=1e-5, rtol=1e-5)

    # ---- Config 5: auto TM + no-pad fast path (B % TM == 0, x streamed as-is) ----
    N5, M5 = 32, 2
    emb5, spk5 = 128, 256
    B5 = N5 * M5
    x5 = jax.random.normal(k1, (B5, emb5), dtype=jnp.float32)
    w5 = jax.random.normal(k2, (spk5, emb5), dtype=jnp.float32) * 0.05
    b5 = jax.random.normal(k3, (spk5,), dtype=jnp.float32) * 0.01
    y5 = jax.random.randint(k4, (N5,), 0, spk5, dtype=jnp.int32)

    loss5, logits5 = si_loss(x5, w5, b5, y5, M5)      # tm=None -> auto
    loss5, logits5 = jax.block_until_ready((loss5, logits5))
    ref_loss5, ref_logits5 = _reference(x5, w5, b5, y5, M5)
    assert jnp.allclose(logits5, ref_logits5, atol=1e-4, rtol=1e-4)
    assert jnp.allclose(loss5, ref_loss5, atol=1e-5, rtol=1e-5)

    print("KERNEL_OK")
</pallas_src>

<mosaic_0001>
module attributes {stable_mosaic.version = 11 : i64} {
  func.func @_siloss_kernel(%arg0: i32, %arg1: memref<8x32xf32, #tpu.memory_space<vmem>>, %arg2: memref<128x32xf32, #tpu.memory_space<vmem>>, %arg3: memref<1x128xf32, #tpu.memory_space<vmem>>, %arg4: memref<8x1xi32, #tpu.memory_space<vmem>>, %arg5: memref<8x128xf32, #tpu.memory_space<vmem>>, %arg6: memref<8x128xf32, #tpu.memory_space<vmem>>) attributes {dimension_semantics = [#tpu.dimension_semantics<parallel>], iteration_bounds = array<i64: 1>, scalar_prefetch = 0 : i64, scratch_operands = 0 : i64, tpu.core_type = #tpu.core_type<tc>, window_params = [{transform_indices = @transform_0, window_bounds = array<i64: 8, 32>}, {pipeline_mode = #tpu.pipeline_mode<synchronous>, transform_indices = @transform_1, window_bounds = array<i64: 128, 32>}, {pipeline_mode = #tpu.pipeline_mode<synchronous>, transform_indices = @transform_2, window_bounds = array<i64: 1, 128>}, {transform_indices = @transform_3, window_bounds = array<i64: 8, 1>}, {transform_indices = @transform_4, window_bounds = array<i64: 8, 128>}, {transform_indices = @transform_5, window_bounds = array<i64: 8, 128>}]} {
    %c0 = arith.constant 0 : index
    %c0_0 = arith.constant 0 : index
    %0 = vector.load %arg2[%c0, %c0_0] : memref<128x32xf32, #tpu.memory_space<vmem>>, vector<128x32xf32>
    %c0_1 = arith.constant 0 : index
    %c0_2 = arith.constant 0 : index
    %1 = vector.load %arg1[%c0_1, %c0_2] : memref<8x32xf32, #tpu.memory_space<vmem>>, vector<8x32xf32>
    %c0_3 = arith.constant 0 : index
    %c0_4 = arith.constant 0 : index
    %2 = vector.load %arg3[%c0_3, %c0_4] : memref<1x128xf32, #tpu.memory_space<vmem>>, vector<1x128xf32>
    %c0_5 = arith.constant 0 : index
    %c0_6 = arith.constant 0 : index
    %3 = vector.load %arg4[%c0_5, %c0_6] : memref<8x1xi32, #tpu.memory_space<vmem>>, vector<8x1xi32>
    %cst = arith.constant dense<0.000000e+00> : vector<8x128xf32>
    %4 = tpu.matmul %1, %0, %cst {dimension_numbers = #tpu.dot_dimension_numbers<[1], [1], [0], [0], [0, 0, 1, 0], [], []>} : vector<8x32xf32>, vector<128x32xf32>, vector<8x128xf32> -> vector<8x128xf32>
    %5 = vector.broadcast %2 : vector<1x128xf32> to vector<8x128xf32>
    %6 = arith.addf %4, %5 : vector<8x128xf32>
    %c0_7 = arith.constant 0 : index
    %c0_8 = arith.constant 0 : index
    %7 = vector.load %arg6[%c0_7, %c0_8] : memref<8x128xf32, #tpu.memory_space<vmem>>, vector<8x128xf32>
    tpu.vector_store %arg6[%c0_7, %c0_8], %6 {strides = array<i32>} : memref<8x128xf32, #tpu.memory_space<vmem>>, vector<8x128xf32>,
    %cst_9 = arith.constant dense<0xFF800000> : vector<8xf32>
    %8 = vector.multi_reduction <maximumf>, %6, %cst_9 [1] : vector<8x128xf32> to vector<8xf32>
    %9 = vector.shape_cast %8 : vector<8xf32> to vector<8x1xf32>
    %10 = vector.broadcast %9 : vector<8x1xf32> to vector<8x128xf32>
    %11 = arith.subf %6, %10 : vector<8x128xf32>
    %12 = math.exp %11 : vector<8x128xf32>
    %cst_10 = arith.constant dense<0.000000e+00> : vector<8xf32>
    %13 = vector.multi_reduction <add>, %12, %cst_10 [1] : vector<8x128xf32> to vector<8xf32>
    %14 = vector.shape_cast %13 : vector<8xf32> to vector<8x1xf32>
    %15 = math.log %14 : vector<8x1xf32>
    %16 = arith.addf %9, %15 : vector<8x1xf32>
    %17 = tpu.iota {dimensions = array<i32: 1>} : vector<1x128xi32>
    %18 = vector.broadcast %17 : vector<1x128xi32> to vector<8x128xi32>
    %19 = vector.broadcast %3 : vector<8x1xi32> to vector<8x128xi32>
    %20 = arith.cmpi eq, %18, %19 : vector<8x128xi32>
    %cst_11 = arith.constant 0xFF800000 : f32
    %21 = vector.broadcast %cst_11 : f32 to vector<8x128xf32>
    %22 = arith.select %20, %6, %21 : vector<8x128xi1>, vector<8x128xf32>
    %cst_12 = arith.constant dense<0xFF800000> : vector<8xf32>
    %23 = vector.multi_reduction <maximumf>, %22, %cst_12 [1] : vector<8x128xf32> to vector<8xf32>
    %24 = vector.shape_cast %23 : vector<8xf32> to vector<8x1xf32>
    %25 = arith.subf %16, %24 : vector<8x1xf32>
    %c8_i32 = arith.constant 8 : i32
    %26 = arith.muli %arg0, %c8_i32 : i32
    %27 = tpu.iota {dimensions = array<i32: 0>} : vector<8x1xi32>
    %28 = vector.broadcast %26 : i32 to vector<8x1xi32>
    %29 = arith.addi %28, %27 : vector<8x1xi32>
    %c8_i32_13 = arith.constant 8 : i32
    %30 = vector.broadcast %c8_i32_13 : i32 to vector<8x1xi32>
    %31 = arith.cmpi slt, %29, %30 : vector<8x1xi32>
    %cst_14 = arith.constant 0.000000e+00 : f32
    %32 = vector.broadcast %cst_14 : f32 to vector<8x1xf32>
    %33 = arith.select %31, %25, %32 : vector<8x1xi1>, vector<8x1xf32>
    %34 = vector.shape_cast %33 : vector<8x1xf32> to vector<1x8x1xf32>
    %cst_15 = arith.constant dense<0.000000e+00> : vector<1xf32>
    %35 = vector.multi_reduction <add>, %34, %cst_15 [1, 2] : vector<1x8x1xf32> to vector<1xf32>
    %36 = vector.shape_cast %35 : vector<1xf32> to vector<1x1x1xf32>
    %37 = vector.extract %36[0, 0, 0] : f32 from vector<1x1x1xf32>
    %38 = vector.broadcast %37 : f32 to vector<8x128xf32>
    %c0_16 = arith.constant 0 : index
    %c0_17 = arith.constant 0 : index
    %39 = vector.load %arg5[%c0_16, %c0_17] : memref<8x128xf32, #tpu.memory_space<vmem>>, vector<8x128xf32>
    tpu.vector_store %arg5[%c0_16, %c0_17], %38 {strides = array<i32>} : memref<8x128xf32, #tpu.memory_space<vmem>>, vector<8x128xf32>,
    return
  }
  func.func @transform_0(%arg0: i32) -> (i32, i32) {
    %c0_i32 = arith.constant 0 : i32
    %c0_i32_0 = arith.constant 0 : i32
    return %arg0, %c0_i32 : i32, i32
  }
  func.func @transform_1(%arg0: i32) -> (i32, i32) {
    %c0_i32 = arith.constant 0 : i32
    %c0_i32_0 = arith.constant 0 : i32
    %c0_i32_1 = arith.constant 0 : i32
    return %c0_i32, %c0_i32_0 : i32, i32
  }
  func.func @transform_2(%arg0: i32) -> (i32, i32) {
    %c0_i32 = arith.constant 0 : i32
    %c0_i32_0 = arith.constant 0 : i32
    %c0_i32_1 = arith.constant 0 : i32
    return %c0_i32, %c0_i32_0 : i32, i32
  }
  func.func @transform_3(%arg0: i32) -> (i32, i32) {
    %c0_i32 = arith.constant 0 : i32
    %c0_i32_0 = arith.constant 0 : i32
    return %arg0, %c0_i32 : i32, i32
  }
  func.func @transform_4(%arg0: i32) -> (i32, i32) {
    %c0_i32 = arith.constant 0 : i32
    %c0_i32_0 = arith.constant 0 : i32
    return %arg0, %c0_i32 : i32, i32
  }
  func.func @transform_5(%arg0: i32) -> (i32, i32) {
    %c0_i32 = arith.constant 0 : i32
    %c0_i32_0 = arith.constant 0 : i32
    return %arg0, %c0_i32 : i32, i32
  }
}

</mosaic_0001>

<bundles_post_ra>
// kernel: tpu_custom_call.1
= control target key start
LH: loop header
LB: loop body
LE: loop exit
PB: predicated region body
PF: predicated region fallthrough
CT: control target
= control target key end

     0   :  { %11 = vsyncpa [#allocation3], 0  ;;  %vm43_vm0 = vcmask 261120   ;;  %s381_s0 = inlined_call_operand.vmem [shape: f32[8,32], index: 0, kind: input, shape index: {}]   ;;  %s382_s1 = inlined_call_operand.vmem [shape: f32[128,32], index: 1, kind: input, shape index: {}]   ;;  %s383_s2 = inlined_call_operand.vmem [shape: f32[1,128], index: 2, kind: input, shape index: {}]   ;;  %s384_s3 = inlined_call_operand.vmem [shape: s32[8,1], index: 3, kind: input, shape index: {}]   ;;  %s385_s4 = inlined_call_operand.hbm [shape: f32[8,128], index: 4, kind: output, shape index: {0}]   ;;  %s386_s5 = inlined_call_operand.hbm [shape: f32[8,128], index: 5, kind: output, shape index: {1}]  }
   0x1   :  { %v36_v0 = vld [vmem:[%s382_s1 + $0x78] sm:$0xff]  ;;  %v35_v1 = vld [vmem:[%s382_s1 + $0x70] sm:$0xff] }
   0x2   :  { %188 = vmatpush.xpose.msk.msra.mxu0 %vm43_vm0, %v36_v0 }
   0x3   :  { %12 = vsyncpa [#allocation5], 0  ;;  %v34_v2 = vld [vmem:[%s382_s1 + $0x68] sm:$0xff]  ;;  %v33_v3 = vld [vmem:[%s382_s1 + $0x60] sm:$0xff]  ;;  %v268_v17 = vmov 0   ;;  %v126_v26 = vlaneseq  ;;  %vm143_vm2 = vcmask 7168  }
   0x4   :  { %v32_v4 = vld [vmem:[%s382_s1 + $0x58] sm:$0xff]  ;;  %v31_v5 = vld [vmem:[%s382_s1 + $0x50] sm:$0xff]  ;;  %v30_v6 = vld [vmem:[%s382_s1 + $0x48] sm:$0xff]  ;;  %210 = vset.pattern.permute.xlu0 %v268_v17  ;;  %s174_s6 = sshll.u32 %s386_s5, 4  ;;  %s270_s7 = smov [#allocation2]   ;;  %s175_s6 = int_to_ptr.hbm [resolvable:$true] %s174_s6 }
   0x5   :  { %v29_v7 = vld [vmem:[%s382_s1 + $0x40] sm:$0xff]  ;;  %v28_v8 = vld [vmem:[%s382_s1 + $0x38] sm:$0xff]  ;;  %v27_v9 = vld [vmem:[%s382_s1 + $0x30] sm:$0xff]  ;;  %v127_v27 = vand.u32 127, %v126_v26  ;;  %s161_s8 = sshll.u32 %s270_s7, 4  ;;  %s163_s11 = sshll.u32 %s385_s4, 4  ;;  %s162_s8 = int_to_ptr.vmem [resolvable:$true] %s161_s8  ;;  %s164_s11 = int_to_ptr.hbm [resolvable:$true] %s163_s11 }
   0x6   :  { %189 = vmatpush.xpose.msk.msra.mxu0 %vm43_vm0, %v35_v1  ;;  %v26_v10 = vld [vmem:[%s382_s1 + $0x28] sm:$0xff]  ;;  %v25_v11 = vld [vmem:[%s382_s1 + $0x20] sm:$0xff]  ;;  %v24_v12 = vld [vmem:[%s382_s1 + $0x18] sm:$0xff] }
   0x7   :  { %v23_v13 = vld [vmem:[%s382_s1 + $0x10] sm:$0xff]  ;;  %v22_v14 = vld [vmem:[%s382_s1 + $0x8] sm:$0xff]  ;;  %v21_v15 = vld [vmem:[%s382_s1] sm:$0xff] }
   0x8   :  { %v37_v16 = vld [vmem:[%s381_s0] sm:$0xff]  ;;  %s269_s0 = smov [#allocation4]  }
   0x9   :  { %v211_v18 = vld [vmem:[%s383_s2] ss:$0 sm:$0xff]  ;;  %s172_s2 = sshll.u32 %s269_s0, 4  ;;  %s173_s2 = int_to_ptr.vmem [resolvable:$true] %s172_s2 }
   0xa   :  { %190 = vmatpush.xpose.msk.msra.mxu0 %vm43_vm0, %v34_v2  ;;  %v39_v21 = vld [vmem:[%s384_s3] sm:$0xff] }
   0xe   :  { %191 = vmatpush.xpose.msk.msra.mxu0 %vm43_vm0, %v33_v3 }
  0x12   :  { %192 = vmatpush.xpose.msk.msra.mxu0 %vm43_vm0, %v32_v4 }
  0x16   :  { %193 = vmatpush.xpose.msk.msra.mxu0 %vm43_vm0, %v31_v5 }
  0x1a   :  { %194 = vmatpush.xpose.msk.msra.mxu0 %vm43_vm0, %v30_v6 }
  0x1e   :  { %195 = vmatpush.xpose.msk.msra.mxu0 %vm43_vm0, %v29_v7 }
  0x22   :  { %196 = vmatpush.xpose.msk.msra.mxu0 %vm43_vm0, %v28_v8 }
  0x26   :  { %197 = vmatpush.xpose.msk.msra.mxu0 %vm43_vm0, %v27_v9 }
  0x2a   :  { %198 = vmatpush.xpose.msk.msra.mxu0 %vm43_vm0, %v26_v10 }
  0x2e   :  { %199 = vmatpush.xpose.msk.msra.mxu0 %vm43_vm0, %v25_v11 }
  0x32   :  { %200 = vmatpush.xpose.msk.msra.mxu0 %vm43_vm0, %v24_v12 }
  0x36   :  { %201 = vmatpush.xpose.msk.msra.mxu0 %vm43_vm0, %v23_v13 }
  0x3a   :  { %202 = vmatpush.xpose.msk.msra.mxu0 %vm43_vm0, %v22_v14 }
  0x3e   :  { %203 = vmatpush.xpose.msk.msra.mxu0 %vm43_vm0, %v21_v15 }
  0x41   :  { %204 = vmatmul.msk.f32.vlgmr.msra.gmra.mxu0 %vm43_vm0, %v37_v16 }
  0xbe   :  { %v112_v19 = vpop.f32.mrf.mxu0 }
  0xbf   :  { %v113_v20 = vadd.f32 %v211_v18, %v112_v19 }
  0xc1   :  { %115 = vst [vmem:[#allocation4] sm:$0xff] %v113_v20  ;;  %116 = vmax.xlane.f32.xlu0 %v113_v20 }
  0xc2   :  { %177 = dma.vmem_to_hbm [thread:$0]  %s173_s2, 128, %s175_s6, [#allocation5]  }
  0xd5   :  { %129 = vperm.xlu0 %210, %v39_v21  }
 0x134   :  { %v117_v22 = vpop.xlane.xlu0 %116 }
 0x135   :  { %v118_v23 = vsub.f32 %v113_v20, %v117_v22 }
 0x137   :  { %v119_v24 = vmul.f32 1.442695, %v118_v23 }
 0x139   :  { %212 = vpow2.f32 %v119_v24 }
 0x13f   :  { %v213_v25 = vpop.eup %212 }
 0x140   :  { %121 = vadd.xlane.f32.xlu1 %v213_v25 }
 0x147   :  { %v130_v28 = vpop.permute.xlu0 %129 }
 0x148   :  { %vm131_vm1 = vcmp.eq.s32.totalorder %v127_v27, %v130_v28 }
 0x149   :  { %v132_v29 = vsel %vm131_vm1, %v113_v20, -inf }
 0x14a   :  { %133 = vmax.xlane.f32.xlu1 %v132_v29 }
 0x1b3   :  { %v122_v30 = vpop.xlane.xlu1 %121 }
 0x1b4   :  { %214 = vlog2.f32 %v122_v30 }
 0x1ba   :  { %v215_v31 = vpop.eup %214 }
 0x1bb   :  { %v124_v32 = vmul.f32 0.6931472, %v215_v31 }
 0x1bd   :  { %v125_v33 = vadd.f32 %v124_v32, %v117_v22  ;;  %v134_v34 = vpop.xlane.xlu1 %133 }
 0x1bf   :  { %v135_v35 = vsub.f32 %v125_v33, %v134_v34 }
 0x1c1   :  { %v144_v36 = vsel %vm143_vm2, %v135_v35, 0.0 }
 0x1c2   :  { %145 = vadd.xlane.f32.xlu2 %v144_v36 }
 0x235   :  { %v146_v37 = vpop.xlane.xlu2 %145 }
 0x236   :  { %v147_v38 = vrot.slane %v146_v37, 4 }
 0x238   :  { %v148_v39 = vadd.f32 %v147_v38, %v146_v37 }
 0x23a   :  { %v149_v40 = vrot.slane %v148_v39, 2 }
 0x23c   :  { %v150_v41 = vadd.f32 %v149_v40, %v148_v39 }
 0x23e   :  { %v151_v42 = vrot.slane %v150_v41, 1 }
 0x240   :  { %v152_v43 = vadd.f32 %v151_v42, %v150_v41 }
 0x242   :  { %205 = vpush %v152_v43 }
 0x273   :  { %s206_s12 = spop %205 }
 0x274   :  { %v154_v44 = vstv %s206_s12 }
 0x275   :  { %155 = vst [vmem:[#allocation2] sm:$0xff] %v154_v44 }
 0x276   :  { %166 = dma.vmem_to_hbm [thread:$0]  %s162_s8, 128, %s164_s11, [#allocation3]  }
 0x277   :  { %264 = dma.done.wait [#allocation3], 128  }
 0x278   :  { %265 = vsyncadd [#allocation3], 4294967168 }
 0x279   :  { %266 = dma.done.wait [#allocation5], 128  }
 0x27a   :  { %267 = vsyncadd [#allocation5], 4294967168 }
 0x27b   :  { %186 = vsyncpa [#allocation3], 1 }
 0x27c   :  { %187 = vsyncpa [#allocation5], 1 }

</bundles_post_ra>
